<compile_context>
chip_gen: v6e
topology: v6e:2x2x1
jax: 0.10.0
libtpu: 0.0.40
codegen_flags: <defaults>
</compile_context>

<pallas_src>
import functools

import jax
import jax.numpy as jnp
from jax.experimental import pallas as pl
from jax.experimental.pallas import tpu as pltpu


def _kd_loss_kernel(s_ref, t_ref, tgt_ref, out_ref, *, T, B):
    i = pl.program_id(0)

    s = s_ref[...].astype(jnp.float32)        # (blk_b, C) student logits
    t = t_ref[...].astype(jnp.float32)        # (blk_b, C) teacher logits
    tgt = tgt_ref[...]                        # (blk_b, 1) int32 labels

    blk_b, c = s.shape

    # Rows past B (tail block of a non-dividing batch) hold unspecified data;
    # sanitize them to 0 so downstream math stays finite, then zero their
    # contributions below.
    row_idx = jax.lax.broadcasted_iota(jnp.int32, (blk_b, 1), 0) + i * blk_b
    row_valid = row_idx < B
    s = jnp.where(row_valid, s, 0.0)
    t = jnp.where(row_valid, t, 0.0)

    # --- hard loss: per-row CE = logsumexp(s) - s[target] --------------------
    cls_idx = jax.lax.broadcasted_iota(jnp.int32, (blk_b, c), 1)
    tgt_mask = cls_idx == tgt
    m_s = jnp.max(s, axis=-1, keepdims=True)
    lse_s = jnp.log(jnp.sum(jnp.exp(s - m_s), axis=-1, keepdims=True)) + m_s
    s_tgt = jnp.sum(jnp.where(tgt_mask, s, 0.0), axis=-1, keepdims=True)
    ce_row = jnp.where(row_valid, lse_s - s_tgt, 0.0)

    # --- soft loss: row KL(softmax(t/T) || softmax(s/T)), simplified ---------
    #   kl = (sum_c e_tT*(z_tT - s_T)) / sum_tT - log(sum_tT) + lse_sT
    inv_T = 1.0 / T
    s_T = s * inv_T
    t_T = t * inv_T

    m_sT = m_s * inv_T                        # exact reuse of the student max
    lse_sT = jnp.log(jnp.sum(jnp.exp(s_T - m_sT), axis=-1, keepdims=True)) + m_sT

    m_tT = jnp.max(t_T, axis=-1, keepdims=True)
    z_tT = t_T - m_tT
    e_tT = jnp.exp(z_tT)
    sum_tT = jnp.sum(e_tT, axis=-1, keepdims=True)
    num = jnp.sum(e_tT * (z_tT - s_T), axis=-1, keepdims=True)
    # Single exact reciprocal on a (blk_b, 1) row scalar (negligible cost;
    # keeps the KL accurate since `num` is O(1) per row).
    kl_row = num * pl.reciprocal(sum_tT) - jnp.log(sum_tT) + lse_sT
    kl_row = jnp.where(row_valid, kl_row, 0.0)

    # --- per-step partial sums -> lane-dense (1, 8, 128) output tile ---------
    ce_sum = jnp.sum(ce_row)
    kl_sum = jnp.sum(kl_row)
    sub = jax.lax.broadcasted_iota(jnp.int32, (1, 8, 128), 1)
    lane = jax.lax.broadcasted_iota(jnp.int32, (1, 8, 128), 2)
    tile = jnp.where((sub == 0) & (lane == 0), ce_sum,
                     jnp.where((sub == 0) & (lane == 1), kl_sum, 0.0))
    out_ref[...] = tile


def kd_loss(s_logits, t_logits, targets, *, l=0.5, T=4.0, block_b=None,
            return_detail=False):
    """s_logits, t_logits: (B, C) float (kept in native dtype); targets: (B,) int."""
    assert s_logits.shape == t_logits.shape, "student/teacher logits must match"
    B, C = s_logits.shape
    itemsize = jnp.dtype(s_logits.dtype).itemsize

    # Physical VMEM of the current chip (v5e/v6e: 128 MiB, v7x: 64 MiB per TC).
    try:
        vmem_cap = int(pltpu.get_tpu_info().vmem_capacity_bytes)
    except Exception:
        vmem_cap = 64 * 1024 * 1024          # conservative fallback

    # Batch tile: multiple of 8 sublanes (or the full batch).  Input-tile
    # budget: ~2 MiB on 64 MiB VMEM (v7x), ~8 MiB on 128 MiB (v5e/v6e).
    if block_b is None:
        tile_budget = (2 if vmem_cap <= 64 * 1024 * 1024 else 8) * 1024 * 1024
        block_b = max(8, tile_budget // (C * itemsize))
    blk_b = int(min(int(block_b), B))
    if blk_b < B:
        blk_b = max(8, (blk_b // 8) * 8)
    n_steps = pl.cdiv(B, blk_b)

    tgt2d = targets.astype(jnp.int32).reshape(B, 1)

    # Scoped-VMEM budget: double-buffered input tiles + f32 compute temps,
    # capped at 75% of physical VMEM so there is always headroom.
    vmem_need = 4 * blk_b * C * itemsize + 8 * blk_b * C * 4 + (1 << 20)
    vmem_ceiling = (vmem_cap * 3) // 4
    vmem_limit = int(min(vmem_ceiling, max(32 * 1024 * 1024, vmem_need)))

    # TODO(synk): large-C (vocab-scale) path — tile the class dim with a second
    # grid axis and online logsumexp/softmax accumulation instead of requiring
    # the full class dim in one block.
    # TODO(synk): measure-gated — bf16 teacher branch on v6e/v7x, MXU offload
    # of plain row sums, pipeline_mode=pl.Buffered(3) on v5e if DMA is exposed.
    kernel = functools.partial(_kd_loss_kernel, T=float(T), B=B)
    partials = pl.pallas_call(
        kernel,
        out_shape=jax.ShapeDtypeStruct((n_steps, 8, 128), jnp.float32),
        grid=(n_steps,),
        in_specs=[
            pl.BlockSpec((blk_b, C), lambda i: (i, 0)),
            pl.BlockSpec((blk_b, C), lambda i: (i, 0)),
            pl.BlockSpec((blk_b, 1), lambda i: (i, 0)),
        ],
        out_specs=pl.BlockSpec((1, 8, 128), lambda i: (i, 0, 0)),
        compiler_params=pltpu.CompilerParams(
            dimension_semantics=("parallel",),
            vmem_limit_bytes=vmem_limit,
        ),
    )(s_logits, t_logits, tgt2d)

    # Trivial final combine + l/T scaling in plain JAX outside the kernel.
    inv_B = 1.0 / B
    hard_loss = jnp.sum(partials[:, 0, 0]) * inv_B
    soft_loss = (T * T) * jnp.sum(partials[:, 0, 1]) * inv_B
    loss = l * hard_loss + (1.0 - l) * soft_loss
    if return_detail:
        return hard_loss, soft_loss, loss
    return loss


if __name__ == "__main__":
    key = jax.random.PRNGKey(0)
    k1, k2, k3 = jax.random.split(key, 3)

    # Small shapes chosen to exercise the unpadded tails:
    #   B=30 (not a multiple of the 8-row tile), C=100 (not a multiple of 128).
    B, C = 30, 100
    l, T = 0.5, 4.0
    s_logits = jax.random.normal(k1, (B, C), dtype=jnp.float32)
    t_logits = jax.random.normal(k2, (B, C), dtype=jnp.float32)
    targets = jax.random.randint(k3, (B,), 0, C, dtype=jnp.int32)

    # block_b=8 -> 4 grid steps, the last one a masked partial batch tile.
    hard, soft, loss = kd_loss(s_logits, t_logits, targets, l=l, T=T,
                               block_b=8, return_detail=True)
    jax.block_until_ready(loss)

    # Pure-JAX reference.
    logp_s = jax.nn.log_softmax(s_logits, axis=-1)
    hard_ref = -jnp.mean(jnp.take_along_axis(logp_s, targets[:, None], axis=-1))
    logp_sT = jax.nn.log_softmax(s_logits / T, axis=-1)
    p_tT = jax.nn.softmax(t_logits / T, axis=-1)
    logp_tT = jax.nn.log_softmax(t_logits / T, axis=-1)
    soft_ref = T * T * jnp.sum(p_tT * (logp_tT - logp_sT)) / B
    loss_ref = l * hard_ref + (1 - l) * soft_ref

    assert jnp.allclose(hard, hard_ref, rtol=2e-3, atol=2e-3), (hard, hard_ref)
    assert jnp.allclose(soft, soft_ref, rtol=2e-3, atol=2e-3), (soft, soft_ref)
    assert jnp.allclose(loss, loss_ref, rtol=2e-3, atol=2e-3), (loss, loss_ref)

    print("KERNEL_OK")
</pallas_src>

<mosaic_0001>
module attributes {stable_mosaic.version = 11 : i64} {
  func.func @_kd_loss_kernel(%arg0: i32, %arg1: memref<8x100xf32, #tpu.memory_space<vmem>>, %arg2: memref<8x100xf32, #tpu.memory_space<vmem>>, %arg3: memref<8x1xi32, #tpu.memory_space<vmem>>, %arg4: memref<1x8x128xf32, #tpu.memory_space<vmem>>) attributes {dimension_semantics = [#tpu.dimension_semantics<parallel>], iteration_bounds = array<i64: 4>, scalar_prefetch = 0 : i64, scratch_operands = 0 : i64, tpu.core_type = #tpu.core_type<tc>, window_params = [{transform_indices = @transform_0, window_bounds = array<i64: 8, 100>}, {transform_indices = @transform_1, window_bounds = array<i64: 8, 100>}, {transform_indices = @transform_2, window_bounds = array<i64: 8, 1>}, {transform_indices = @transform_3, window_bounds = array<i64: 1, 8, 128>}]} {
    %c0 = arith.constant 0 : index
    %c0_0 = arith.constant 0 : index
    %0 = vector.load %arg1[%c0, %c0_0] : memref<8x100xf32, #tpu.memory_space<vmem>>, vector<8x100xf32>
    %c0_1 = arith.constant 0 : index
    %c0_2 = arith.constant 0 : index
    %1 = vector.load %arg2[%c0_1, %c0_2] : memref<8x100xf32, #tpu.memory_space<vmem>>, vector<8x100xf32>
    %c0_3 = arith.constant 0 : index
    %c0_4 = arith.constant 0 : index
    %2 = vector.load %arg3[%c0_3, %c0_4] : memref<8x1xi32, #tpu.memory_space<vmem>>, vector<8x1xi32>
    %3 = tpu.iota {dimensions = array<i32: 0>} : vector<8x1xi32>
    %c8_i32 = arith.constant 8 : i32
    %4 = arith.muli %arg0, %c8_i32 : i32
    %5 = vector.broadcast %4 : i32 to vector<8x1xi32>
    %6 = arith.addi %3, %5 : vector<8x1xi32>
    %c30_i32 = arith.constant 30 : i32
    %7 = vector.broadcast %c30_i32 : i32 to vector<8x1xi32>
    %8 = arith.cmpi slt, %6, %7 : vector<8x1xi32>
    %cst = arith.constant 0.000000e+00 : f32
    %9 = vector.shape_cast %8 : vector<8x1xi1> to vector<8x1xi1>
    %10 = vector.broadcast %9 : vector<8x1xi1> to vector<8x100xi1>
    %11 = vector.broadcast %cst : f32 to vector<8x100xf32>
    %12 = arith.select %10, %0, %11 : vector<8x100xi1>, vector<8x100xf32>
    %cst_5 = arith.constant 0.000000e+00 : f32
    %13 = vector.shape_cast %8 : vector<8x1xi1> to vector<8x1xi1>
    %14 = vector.broadcast %13 : vector<8x1xi1> to vector<8x100xi1>
    %15 = vector.broadcast %cst_5 : f32 to vector<8x100xf32>
    %16 = arith.select %14, %1, %15 : vector<8x100xi1>, vector<8x100xf32>
    %17 = tpu.iota {dimensions = array<i32: 1>} : vector<8x100xi32>
    %18 = vector.broadcast %2 : vector<8x1xi32> to vector<8x100xi32>
    %19 = arith.cmpi eq, %17, %18 : vector<8x100xi32>
    %cst_6 = arith.constant dense<0xFF800000> : vector<8xf32>
    %20 = vector.multi_reduction <maximumf>, %12, %cst_6 [1] : vector<8x100xf32> to vector<8xf32>
    %21 = vector.shape_cast %20 : vector<8xf32> to vector<8x1xf32>
    %22 = vector.broadcast %21 : vector<8x1xf32> to vector<8x100xf32>
    %23 = arith.subf %12, %22 : vector<8x100xf32>
    %24 = math.exp %23 : vector<8x100xf32>
    %cst_7 = arith.constant dense<0.000000e+00> : vector<8xf32>
    %25 = vector.multi_reduction <add>, %24, %cst_7 [1] : vector<8x100xf32> to vector<8xf32>
    %26 = vector.shape_cast %25 : vector<8xf32> to vector<8x1xf32>
    %27 = math.log %26 : vector<8x1xf32>
    %28 = arith.addf %27, %21 : vector<8x1xf32>
    %cst_8 = arith.constant 0.000000e+00 : f32
    %29 = vector.broadcast %cst_8 : f32 to vector<8x100xf32>
    %30 = arith.select %19, %12, %29 : vector<8x100xi1>, vector<8x100xf32>
    %cst_9 = arith.constant dense<0.000000e+00> : vector<8xf32>
    %31 = vector.multi_reduction <add>, %30, %cst_9 [1] : vector<8x100xf32> to vector<8xf32>
    %32 = vector.shape_cast %31 : vector<8xf32> to vector<8x1xf32>
    %33 = arith.subf %28, %32 : vector<8x1xf32>
    %cst_10 = arith.constant 0.000000e+00 : f32
    %34 = vector.broadcast %cst_10 : f32 to vector<8x1xf32>
    %35 = arith.select %8, %33, %34 : vector<8x1xi1>, vector<8x1xf32>
    %cst_11 = arith.constant 2.500000e-01 : f32
    %36 = vector.broadcast %cst_11 : f32 to vector<8x100xf32>
    %37 = arith.mulf %12, %36 : vector<8x100xf32>
    %cst_12 = arith.constant 2.500000e-01 : f32
    %38 = vector.broadcast %cst_12 : f32 to vector<8x100xf32>
    %39 = arith.mulf %16, %38 : vector<8x100xf32>
    %cst_13 = arith.constant 2.500000e-01 : f32
    %40 = vector.broadcast %cst_13 : f32 to vector<8x1xf32>
    %41 = arith.mulf %21, %40 : vector<8x1xf32>
    %42 = vector.broadcast %41 : vector<8x1xf32> to vector<8x100xf32>
    %43 = arith.subf %37, %42 : vector<8x100xf32>
    %44 = math.exp %43 : vector<8x100xf32>
    %cst_14 = arith.constant dense<0.000000e+00> : vector<8xf32>
    %45 = vector.multi_reduction <add>, %44, %cst_14 [1] : vector<8x100xf32> to vector<8xf32>
    %46 = vector.shape_cast %45 : vector<8xf32> to vector<8x1xf32>
    %47 = math.log %46 : vector<8x1xf32>
    %48 = arith.addf %47, %41 : vector<8x1xf32>
    %cst_15 = arith.constant dense<0xFF800000> : vector<8xf32>
    %49 = vector.multi_reduction <maximumf>, %39, %cst_15 [1] : vector<8x100xf32> to vector<8xf32>
    %50 = vector.shape_cast %49 : vector<8xf32> to vector<8x1xf32>
    %51 = vector.broadcast %50 : vector<8x1xf32> to vector<8x100xf32>
    %52 = arith.subf %39, %51 : vector<8x100xf32>
    %53 = math.exp %52 : vector<8x100xf32>
    %cst_16 = arith.constant dense<0.000000e+00> : vector<8xf32>
    %54 = vector.multi_reduction <add>, %53, %cst_16 [1] : vector<8x100xf32> to vector<8xf32>
    %55 = vector.shape_cast %54 : vector<8xf32> to vector<8x1xf32>
    %56 = arith.subf %52, %37 : vector<8x100xf32>
    %57 = arith.mulf %53, %56 : vector<8x100xf32>
    %cst_17 = arith.constant dense<0.000000e+00> : vector<8xf32>
    %58 = vector.multi_reduction <add>, %57, %cst_17 [1] : vector<8x100xf32> to vector<8xf32>
    %59 = vector.shape_cast %58 : vector<8xf32> to vector<8x1xf32>
    %60 = tpu.reciprocal %55 : vector<8x1xf32> -> vector<8x1xf32>
    %61 = arith.mulf %59, %60 : vector<8x1xf32>
    %62 = math.log %55 : vector<8x1xf32>
    %63 = arith.subf %61, %62 : vector<8x1xf32>
    %64 = arith.addf %63, %48 : vector<8x1xf32>
    %cst_18 = arith.constant 0.000000e+00 : f32
    %65 = vector.broadcast %cst_18 : f32 to vector<8x1xf32>
    %66 = arith.select %8, %64, %65 : vector<8x1xi1>, vector<8x1xf32>
    %67 = vector.shape_cast %35 : vector<8x1xf32> to vector<1x8x1xf32>
    %cst_19 = arith.constant dense<0.000000e+00> : vector<1xf32>
    %68 = vector.multi_reduction <add>, %67, %cst_19 [1, 2] : vector<1x8x1xf32> to vector<1xf32>
    %69 = vector.shape_cast %68 : vector<1xf32> to vector<1x1x1xf32>
    %70 = vector.extract %69[0, 0, 0] : f32 from vector<1x1x1xf32>
    %71 = vector.shape_cast %66 : vector<8x1xf32> to vector<1x8x1xf32>
    %cst_20 = arith.constant dense<0.000000e+00> : vector<1xf32>
    %72 = vector.multi_reduction <add>, %71, %cst_20 [1, 2] : vector<1x8x1xf32> to vector<1xf32>
    %73 = vector.shape_cast %72 : vector<1xf32> to vector<1x1x1xf32>
    %74 = vector.extract %73[0, 0, 0] : f32 from vector<1x1x1xf32>
    %75 = tpu.iota {dimensions = array<i32: 1>} : vector<1x8x128xi32>
    %76 = tpu.iota {dimensions = array<i32: 2>} : vector<1x8x128xi32>
    %c0_i32 = arith.constant 0 : i32
    %77 = vector.broadcast %c0_i32 : i32 to vector<1x8x128xi32>
    %78 = arith.cmpi eq, %75, %77 : vector<1x8x128xi32>
    %c0_i32_21 = arith.constant 0 : i32
    %79 = vector.broadcast %c0_i32_21 : i32 to vector<1x8x128xi32>
    %80 = arith.cmpi eq, %76, %79 : vector<1x8x128xi32>
    %81 = arith.andi %78, %80 : vector<1x8x128xi1>
    %c0_i32_22 = arith.constant 0 : i32
    %82 = vector.broadcast %c0_i32_22 : i32 to vector<1x8x128xi32>
    %83 = arith.cmpi eq, %75, %82 : vector<1x8x128xi32>
    %c1_i32 = arith.constant 1 : i32
    %84 = vector.broadcast %c1_i32 : i32 to vector<1x8x128xi32>
    %85 = arith.cmpi eq, %76, %84 : vector<1x8x128xi32>
    %86 = arith.andi %83, %85 : vector<1x8x128xi1>
    %cst_23 = arith.constant 0.000000e+00 : f32
    %87 = vector.broadcast %74 : f32 to vector<1x8x128xf32>
    %88 = vector.broadcast %cst_23 : f32 to vector<1x8x128xf32>
    %89 = arith.select %86, %87, %88 : vector<1x8x128xi1>, vector<1x8x128xf32>
    %90 = vector.broadcast %70 : f32 to vector<1x8x128xf32>
    %91 = arith.select %81, %90, %89 : vector<1x8x128xi1>, vector<1x8x128xf32>
    %c0_24 = arith.constant 0 : index
    %c0_25 = arith.constant 0 : index
    %c0_26 = arith.constant 0 : index
    %92 = vector.load %arg4[%c0_24, %c0_25, %c0_26] : memref<1x8x128xf32, #tpu.memory_space<vmem>>, vector<1x8x128xf32>
    tpu.vector_store %arg4[%c0_24, %c0_25, %c0_26], %91 {strides = array<i32>} : memref<1x8x128xf32, #tpu.memory_space<vmem>>, vector<1x8x128xf32>,
    return
  }
  func.func @transform_0(%arg0: i32) -> (i32, i32) {
    %c0_i32 = arith.constant 0 : i32
    %c0_i32_0 = arith.constant 0 : i32
    return %arg0, %c0_i32 : i32, i32
  }
  func.func @transform_1(%arg0: i32) -> (i32, i32) {
    %c0_i32 = arith.constant 0 : i32
    %c0_i32_0 = arith.constant 0 : i32
    return %arg0, %c0_i32 : i32, i32
  }
  func.func @transform_2(%arg0: i32) -> (i32, i32) {
    %c0_i32 = arith.constant 0 : i32
    %c0_i32_0 = arith.constant 0 : i32
    return %arg0, %c0_i32 : i32, i32
  }
  func.func @transform_3(%arg0: i32) -> (i32, i32, i32) {
    %c0_i32 = arith.constant 0 : i32
    %c0_i32_0 = arith.constant 0 : i32
    %c0_i32_1 = arith.constant 0 : i32
    return %arg0, %c0_i32, %c0_i32_0 : i32, i32, i32
  }
}

</mosaic_0001>

<bundles_post_ra>
// kernel: tpu_custom_call.1
= control target key start
LH: loop header
LB: loop body
LE: loop exit
PB: predicated region body
PF: predicated region fallthrough
CT: control target
= control target key end

     0   :  { %8 = vsyncpa [#allocation3], 0  ;;  %s814_s0 = inlined_call_operand.vmem [shape: f32[30,100], index: 0, kind: input, shape index: {}]   ;;  %s815_s1 = inlined_call_operand.hbm [shape: f32[30,100], index: 1, kind: input, shape index: {}]   ;;  %s816_s2 = inlined_call_operand.vmem [shape: s32[30,1], index: 2, kind: input, shape index: {}]   ;;  %s817_s3 = inlined_call_operand.hbm [shape: f32[4,8,128], index: 3, kind: output, shape index: {}]  }
   0x1   :  { %10 = vsyncpa [#allocation3 + $0x1], 0 }
   0x2   :  { %11 = vsyncpa [#allocation4], 0 }
   0x3   :  { %13 = vsyncpa [#allocation4 + $0x1], 0  ;;  %s629_s12 = smov 0   ;;  %s631_s13 = smov 0  }
   0x4   :  { %s633_s14 = smov 0   ;;  %s635_s15 = smov 0  }
   0x5 LB: > { %s650_s16 = sadd.s32 4294967295, %s604_s15   ;;  %s430_s17 = sadd.s32 4294967294, %s604_s15   ;;  %s604_s15 = sphi %s635_s15, %s833_s15   ;;  %s600_s14 = sphi %s633_s14, %s832_s14   ;;  %s596_s13 = sphi %s631_s13, %s831_s13   ;;  %s592_s12 = sphi %s629_s12, %s830_s12  }
   0x6   : > { %s654_s18 = sadd.s32 1, %s604_s15   ;;  %s52_s19 = sadd.s32 1, %s600_s14 }
   0x7   : > { %s49_s20 = ssub.s32 %s604_s15, %s654_s18  ;;  %p59_p0 = scmp.ne.s32.totalorder %s600_s14, %s596_s13 }
   0x8   : > { %p50_p1 = scmp.eq.s32.totalorder %s49_s20, 0  ;;  %p60_p2 = scmp.eq.s32.totalorder %s604_s15, 0 }
   0x9   : > { %p65_p3 = scmp.ne.s32.totalorder %s596_s13, %s592_s12  ;;  %p66_p4 = scmp.eq.s32.totalorder %s650_s16, 0 }
   0xa   : > { %s666_s21 = scalar_select %p50_p1, %s600_s14, %s52_s19  }
   0xb   : > { %p668_p5 = por %p60_p2, %p59_p0  ;;  %p672_p6 = por %p66_p4, %p65_p3 }
   0xc   : > { %p115_p7 = scmp.eq.s32.totalorder %s650_s16, 3  ;;  %p121_p8 = scmp.eq.s32.totalorder %s430_s17, 3 }
   0xd   : > { %s821_s23 = scalar_select %p672_p6, 1, 0 }
   0xe   : > { %p461_p9 = scmp.lt.s32.totalorder %s604_s15, 4  ;;  %p678_p10 = por %p115_p7, %p59_p0 }
   0xf   : > { %p682_p11 = por %p121_p8, %p65_p3  ;;  %s148_s26 = sand.u32 1, %s600_s14  }
  0x10   : > { %s822_s24 = scalar_select %p678_p10, 1, 0 }
  0x11   : > { %s823_s25 = scalar_select %p682_p11, 1, 0 }
  0x12   : > { %s434_s27 = sshll.u32 %s604_s15, 7  ;;  %s433_s28 = sshll.u32 %s148_s26, 3 }
  0x13   : > { %s691_s4 = scalar_lea.hbm %s815_s1, %s434_s27  ;;  %s152_s5 = scalar_lea.vmem [#allocation2], %s433_s28 }
  0x14   : > { %s159_s6 = sshll.u32 %s152_s5, 4  ;;  %p695_p12 = pnand %p461_p9, %p668_p5  ;;  %s699_s6 = int_to_ptr.vmem [resolvable:$true] %s159_s6 }
  0x15   : > { %s149_s8 = scalar_lea.sflag [#allocation3], %s148_s26  ;;  %s512_s9 = scalar_lea.hbm %s691_s4, 128 }
  0x16   : > { %p513_p1 = scmp.ne.s32.totalorder %s691_s4, %s512_s9  ;;  %p514_p2 = pneg %p695_p12 }
  0x17   : > { %s517_s17 = scalar_lea.hbm %s815_s1, 512  ;;  %p518_p5 = scmp.lt.s32.totalorder %s691_s4, %s815_s1 }
  0x18   : > { %p515_p3 = pnand %p514_p2, %p513_p1  ;;  %p519_p7 = scmp.lt.s32.totalorder %s517_s17, %s512_s9 }
  0x1a   : > { %p516_p4 = pneg %p515_p3  ;;  %p520_p8 = por %p519_p7, %p518_p5 }
  0x1c   : > { %p521_p9 = pnand %p520_p8, %p516_p4 }
  0x1e   : > { %524 = shalt.err (!%p521_p9)
}
  0x1f   : > { %s525_s22 = scalar_lea.vmem %s699_s6, 128  ;;  %s606_s26 = smov [#allocation2]  }
  0x20   : > { %p526_p13 = scmp.ne.s32.totalorder %s699_s6, %s525_s22  ;;  %s530_s27 = sshll.u32 %s606_s26, 4  ;;  %s531_s27 = int_to_ptr.vmem [resolvable:$false] %s530_s27 }
  0x21   : > { %s532_s28 = scalar_lea.vmem %s531_s27, 256  ;;  %p533_p3 = scmp.lt.s32.totalorder %s699_s6, %s531_s27 }
  0x22   : > { %p528_p0 = pnand %p526_p13, %p514_p2  ;;  %p534_p11 = scmp.lt.s32.totalorder %s532_s28, %s525_s22 }
  0x24   : > { %p529_p1 = pneg %p528_p0  ;;  %p535_p10 = por %p534_p11, %p533_p3 }
  0x26   : > { %p536_p6 = pnand %p535_p10, %p529_p1 }
  0x28   : > { %539 = shalt.err (!%p536_p6)
}
  0x29   : > { %456 = dma.hbm_to_vmem [thread:$0]  (!%p695_p12), %s691_s4, 128, %s699_s6, %s149_s8  }
  0x2a   : > { %p825_p4 = scmp.lt.s32.totalorder %s604_s15, 5  ;;  %p826_p5 = scmp.ge.s32.totalorder %s604_s15, 1 }
  0x2c   : > { %p172_p13 = pnand %p826_p5, %p825_p4 }
  0x2d   : > { %s726_s29 = sand.u32 (!%p172_p13), 1, %s596_s13   ;;  %p827_p6 = scmp.ne.s32.totalorder (!%p172_p13), %s821_s23, 0 }
  0x2e   : > { %175 = sbr.rel (%p172_p13) target bundleno = 601 (0x259), region = 32  ;;  %s436_s30 = sshll.u32 (!%p172_p13), %s726_s29, 3 }
  0x2f   : > { %s178_s5 = scalar_lea.sflag (!%p172_p13), [#allocation3], %s726_s29  ;;  %s181_s7 = scalar_lea.vmem (!%p172_p13), [#allocation2], %s436_s30 }
  0x33   : > { %583 = dma.done.wait (%p827_p6), %s178_s5, 128  }
  0x34   : > { %585 = vsyncadd (%p827_p6), %s178_s5, 4294967168  ;;  %p212_p10 = scmp.lt.s32.totalorder %s650_s16, 3  ;;  %v223_v0 = vlaneseq  ;;  %s440_s4 = sshll.u32 %s650_s16, 3  ;;  %v607_v2 = vmov 0   ;;  %vm239_vm1 = vcmask 818176   ;;  %v221_v6 = vld [vmem:[%s181_s7] sm:$0xff] }
  0x35   : > { %v226_v1 = vstv %s440_s4  ;;  %496 = vset.pattern.permute.xlu1 %v607_v2  ;;  %497 = vset.pattern.permute.xlu0 %v607_v2  ;;  %vm291_vm3 = vcmask 7168   ;;  %s442_s20 = sshll.u32 %s650_s16, 7  ;;  %s211_s26 = scalar_lea.vmem [#allocation5], %s436_s30 }
  0x36   : > { %s213_s6 = scalar_select %p212_p10, %s650_s16, 3  ;;  %v739_v3 = vshrl.u32 %v223_v0, 7  ;;  %v759_v27 = vand.u32 127, %v223_v0 }
  0x37   : > { %s336_s27 = sshll.u32 %s211_s26, 4  ;;  %s778_s4 = scalar_lea.hbm %s817_s3, %s442_s20  ;;  %s337_s27 = int_to_ptr.vmem [resolvable:$true] %s336_s27 }
  0x38   : > { %s438_s8 = sshll.u32 %s213_s6, 3  ;;  %v742_v4 = vadd.s32 %v226_v1, %v739_v3  ;;  %vm312_vm4 = vcmp.eq.s32.totalorder %v739_v3, 0  ;;  %vm315_vm5 = vcmp.eq.s32.totalorder %v759_v27, 1  ;;  %vm313_vm6 = vcmp.eq.s32.totalorder %v759_v27, 0  ;;  %s323_s16 = scalar_lea.sflag [#allocation4], %s726_s29 }
  0x39   : > { %s215_s10 = scalar_lea.vmem %s814_s0, %s438_s8  ;;  %s219_s19 = scalar_lea.vmem %s816_s2, %s438_s8  ;;  %vm316_vm7 = vmand %vm312_vm4, %vm315_vm5 }
  0x3a   : > { %vm228_vm0 = vcmp.lt.s32.totalorder %v742_v4, 30  ;;  %v220_v5 = vld [vmem:[%s215_s10] sm:$0xff]  ;;  %vm314_vm8 = vmand %vm312_vm4, %vm313_vm6  ;;  %s540_s6 = scalar_lea.vmem %s337_s27, 128  ;;  %p828_p12 = scmp.ne.s32.totalorder %s822_s24, 0 }
  0x3b   : > { %v222_v7 = vld [vmem:[%s219_s19] sm:$0xff]  ;;  %v231_v8 = vsel %vm228_vm0, %v220_v5, 0.0  ;;  %v232_v9 = vsel %vm228_vm0, %v221_v6, 0.0  ;;  %p541_p11 = scmp.ne.s32.totalorder %s337_s27, %s540_s6  ;;  %s608_s30 = smov [#allocation5]  }
  0x3c   : > { %236 = vperm.xlu1 %496, %v222_v7   ;;  %v240_v10 = vsel %vm239_vm1, %v231_v8, -inf  ;;  %v259_v11 = vmul.f32 0.25, %v232_v9  ;;  %v258_v13 = vmul.f32 0.25, %v231_v8  ;;  %s544_s8 = sshll.u32 %s608_s30, 4  ;;  %s545_s8 = int_to_ptr.vmem [resolvable:$false] %s544_s8 }
  0x3d   : > { %241 = vmax.xlane.f32.xlu0 %v240_v10  ;;  %p542_p0 = pnand %p541_p11, %p828_p12  ;;  %s546_s9 = scalar_lea.vmem %s545_s8, 256 }
  0x3e   : > { %v270_v12 = vsel %vm239_vm1, %v259_v11, -inf  ;;  %p547_p7 = scmp.lt.s32.totalorder %s337_s27, %s545_s8  ;;  %p548_p8 = scmp.lt.s32.totalorder %s546_s9, %s540_s6 }
  0x3f   : > { %p543_p2 = pneg %p542_p0 }
  0x40   : > { %p549_p9 = por %p548_p8, %p547_p7 }
  0x41   : > { %271 = vmax.xlane.f32.xlu0 %v270_v12 }
  0x42   : > { %p550_p1 = pnand %p549_p9, %p543_p2 }
  0xb7   : > { %v237_v29 = vpop.permute.xlu1 %236 }
  0xb8   : > { %vm238_vm2 = vcmp.eq.s32.totalorder %v759_v27, %v237_v29 }
  0xb9   : > { %v252_v33 = vsel %vm238_vm2, %v231_v8, 0.0 }
  0xba   : > { %v253_v35 = vsel %vm239_vm1, %v252_v33, 0.0 }
  0xc6   : > { %v242_v14 = vpop.xlane.xlu0 %241 }
  0xc7   : > { %v243_v15 = vsub.f32 %v231_v8, %v242_v14  ;;  %v260_v16 = vmul.f32 0.25, %v242_v14 }
  0xc9   : > { %v244_v17 = vmul.f32 1.442695, %v243_v15  ;;  %v261_v18 = vsub.f32 %v258_v13, %v260_v16 }
  0xca   : > { %v272_v19 = vpop.xlane.xlu0 %271 }
  0xcb   : > { %498 = vpow2.f32 %v244_v17  ;;  %v262_v20 = vmul.f32 1.442695, %v261_v18  ;;  %v273_v21 = vsub.f32 %v259_v11, %v272_v19 }
  0xcd   : > { %500 = vpow2.f32 %v262_v20  ;;  %v274_v22 = vmul.f32 1.442695, %v273_v21  ;;  %v279_v30 = vsub.f32 %v273_v21, %v258_v13 }
  0xcf   : > { %502 = vpow2.f32 %v274_v22 }
  0xd8   : > { %v499_v23 = vpop.eup %498 }
  0xd9   : > { %v246_v24 = vsel %vm239_vm1, %v499_v23, 0.0 }
  0xda   : > { %v501_v25 = vpop.eup %500  ;;  %247 = vadd.xlane.f32.xlu1 %v246_v24 }
  0xdb   : > { %v264_v26 = vsel %vm239_vm1, %v501_v25, 0.0 }
  0xdc   : > { %v503_v28 = vpop.eup %502  ;;  %265 = vadd.xlane.f32.xlu0 %v264_v26 }
  0xdd   : > { %v276_v31 = vsel %vm239_vm1, %v503_v28, 0.0  ;;  %v280_v32 = vmul.f32 %v503_v28, %v279_v30 }
  0xdf   : > { %v281_v34 = vsel %vm239_vm1, %v280_v32, 0.0 }
  0xe0   : > { %277 = vadd.xlane.f32.xlu0 %v276_v31 }
  0xe4   : > { %282 = vadd.xlane.f32.xlu0 %v281_v34 }
  0xe8   : > { %254 = vadd.xlane.f32.xlu0 %v253_v35 }
 0x163   : > { %v248_v36 = vpop.xlane.xlu1 %247 }
 0x164   : > { %504 = vlog2.f32 %v248_v36 }
 0x165   : > { %v266_v37 = vpop.xlane.xlu0 %265 }
 0x166   : > { %506 = vlog2.f32 %v266_v37 }
 0x169   : > { %v278_v38 = vpop.xlane.xlu0 %277 }
 0x16a   : > { %508 = vrcp.f32 %v278_v38 }
 0x16b   : > { %510 = vlog2.f32 %v278_v38 }
 0x16d   : > { %v283_v39 = vpop.xlane.xlu0 %282 }
 0x171   : > { %v505_v40 = vpop.eup %504  ;;  %v255_v42 = vpop.xlane.xlu0 %254 }
 0x172   : > { %v250_v41 = vmul.f32 0.6931472, %v505_v40 }
 0x173   : > { %v507_v43 = vpop.eup %506 }
 0x174   : > { %v251_v44 = vadd.f32 %v250_v41, %v242_v14  ;;  %v268_v47 = vmul.f32 0.6931472, %v507_v43 }
 0x176   : > { %v256_v45 = vsub.f32 %v251_v44, %v255_v42  ;;  %v269_v54 = vadd.f32 %v268_v47, %v260_v16 }
 0x177   : > { %v509_v46 = vpop.eup %508 }
 0x178   : > { %v511_v48 = vpop.eup %510  ;;  %v285_v49 = vmul.f32 %v509_v46, %v283_v39  ;;  %v257_v50 = vsel %vm228_vm0, %v256_v45, 0.0 }
 0x179   : > { %v287_v51 = vmul.f32 0.6931472, %v511_v48  ;;  %v292_v52 = vsel %vm291_vm3, %v257_v50, 0.0 }
 0x17a   : > { %293 = vadd.xlane.f32.xlu0 %v292_v52 }
 0x17b   : > { %v288_v53 = vsub.f32 %v285_v49, %v287_v51 }
 0x17d   : > { %v289_v55 = vadd.f32 %v288_v53, %v269_v54 }
 0x17f   : > { %v290_v56 = vsel %vm228_vm0, %v289_v55, 0.0 }
 0x180   : > { %v302_v57 = vsel %vm291_vm3, %v290_v56, 0.0 }
 0x181   : > { %303 = vadd.xlane.f32.xlu0 %v302_v57 }
 0x203   : > { %v294_v58 = vpop.xlane.xlu0 %293 }
 0x204   : > { %v295_v59 = vrot.slane %v294_v58, 4 }
 0x206   : > { %v296_v60 = vadd.f32 %v295_v59, %v294_v58 }
 0x208   : > { %v297_v61 = vrot.slane %v296_v60, 2 }
 0x20a   : > { %v304_v62 = vpop.xlane.xlu0 %303  ;;  %v298_v63 = vadd.f32 %v297_v61, %v296_v60 }
 0x20b   : > { %v305_v0 = vrot.slane %v304_v62, 4 }
 0x20c   : > { %v299_v1 = vrot.slane %v298_v63, 1 }
 0x20d   : > { %v306_v2 = vadd.f32 %v305_v0, %v304_v62 }
 0x20e   : > { %v300_v5 = vadd.f32 %v299_v1, %v298_v63 }
 0x20f   : > { %v307_v6 = vrot.slane %v306_v2, 2 }
 0x210   : > { %445 = vpush %v300_v5 }
 0x211   : > { %v308_v7 = vadd.f32 %v307_v6, %v306_v2 }
 0x213   : > { %v309_v8 = vrot.slane %v308_v7, 1 }
 0x215   : > { %v310_v4 = vadd.f32 %v309_v8, %v308_v7 }
 0x217   : > { %447 = vpush %v310_v4 }
 0x241   : > { %s446_s22 = spop %445 }
 0x242   : > { %v319_v10 = vstv %s446_s22 }
 0x248   : > { %s448_s28 = spop %447 }
 0x249   : > { %v317_v9 = vstv %s448_s28 }
 0x24a   : > { %v318_v11 = vsel %vm316_vm7, %v317_v9, 0.0 }
 0x24b   : > { %v320_v3 = vsel %vm314_vm8, %v319_v10, %v318_v11 }
 0x24c   : > { %321 = vst [vmem:[%s211_s26] sm:$0xff] %v320_v3 }
 0x24d   : > { %553 = shalt.err (!%p550_p1)
}
 0x24e   : > { %s554_s23 = scalar_lea.hbm %s778_s4, 128  ;;  %s558_s11 = scalar_lea.hbm %s817_s3, 512 }
 0x24f   : > { %p555_p3 = scmp.ne.s32.totalorder %s778_s4, %s554_s23  ;;  %p559_p13 = scmp.lt.s32.totalorder %s778_s4, %s817_s3 }
 0x250   : > { %p560_p6 = scmp.lt.s32.totalorder %s558_s11, %s554_s23 }
 0x251   : > { %p556_p4 = pnand %p555_p3, %p828_p12 }
 0x252   : > { %p561_p10 = por %p560_p6, %p559_p13 }
 0x253   : > { %p557_p5 = pneg %p556_p4 }
 0x255   : > { %p562_p11 = pnand %p561_p10, %p557_p5 }
 0x257   : > { %565 = shalt.err (!%p562_p11)
}
 0x258   : > { %451 = dma.vmem_to_hbm [thread:$0]  (%p828_p12), %s337_s27, 128, %s778_s4, %s323_s16  }
 0x259 PF: > { %p462_p0 = scmp.ge.s32.totalorder %s604_s15, 2  ;;  %s348_s20 = sand.u32 1, %s592_s12  }
 0x25a   : > { %p829_p2 = scmp.ne.s32.totalorder %s823_s25, 0  ;;  %s349_s22 = scalar_lea.sflag [#allocation4], %s348_s20 }
 0x25c   : > { %p458_p7 = pnand %p462_p0, %p829_p2 }
 0x25e   : > { %p459_p8 = pneg %p458_p7 }
 0x260   : > { %587 = dma.done.wait (%p459_p8), %s349_s22, 128  }
 0x261   : > { %589 = vsyncadd (%p459_p8), %s349_s22, 4294967168  ;;  %p16_p9 = scmp.ge.s32.totalorder %s654_s18, 6   ;;  %s830_s12 = smov %s596_s13 }
 0x262   : > { %s831_s13 = smov %s600_s14  ;;  %s832_s14 = smov %s666_s21 }
 0x263   : > { %s833_s15 = smov %s654_s18  ;;  %18 = sbr.rel (!%p16_p9) target bundleno = 5 (0x5), region = 83 }
 0x268   :  { %354 = vsyncpa [#allocation3], 1 }
 0x269   :  { %356 = vsyncpa [#allocation3 + $0x1], 1 }
 0x26a   :  { %357 = vsyncpa [#allocation4], 1 }
 0x26b   :  { %359 = vsyncpa [#allocation4 + $0x1], 1 }

</bundles_post_ra>
